<compile_context>
chip_gen: v7x
topology: tpu7x:2x2x1
jax: 0.10.0
libtpu: 0.0.40
codegen_flags: <defaults>
</compile_context>

<pallas_src>
import functools

import jax
import jax.numpy as jnp
from jax.experimental import pallas as pl
from jax.experimental.pallas import tpu as pltpu

LANES = 128
SUBLANES = 8
CHUNK = SUBLANES * LANES          # 1024: main-body granularity (rows % 8 == 0)
TARGET_BLOCK_BYTES = 2 << 20      # ~2 MiB per operand block


def _bce_elem(x, t, pos_weight):
    """Per-element pos-weighted BCE-with-logits (PyTorch semantics), f32."""
    # loss = (1 - t) * x + (1 + (pw - 1) * t) * log(1 + exp(-x))
    # with a numerically stable softplus(-x).
    softplus_neg_x = jnp.maximum(-x, 0.0) + jnp.log1p(jnp.exp(-jnp.abs(x)))
    return (1.0 - t) * x + (1.0 + (pos_weight - 1.0) * t) * softplus_neg_x


def _is_dual_tensorcore_chip() -> bool:
    """True for chips with two TensorCores per device (e.g. TPU v7x)."""
    try:
        kind = str(getattr(jax.devices()[0], "device_kind", "")).lower()
    except Exception:
        return False
    return "v7" in kind or "tpu7" in kind


def _focal_bce_kernel(x_ref, t_ref, o_ref, *, pos_weight, rows, tile_rows,
                      blocks_per_core):
    """Accumulates pos-weighted BCE terms into a resident (8,128) slab/core."""
    c = pl.program_id(0)   # core-split axis
    i = pl.program_id(1)   # reduction axis ("arbitrary")

    @pl.when(i == 0)
    def _():
        o_ref[...] = jnp.zeros_like(o_ref)

    # Stream native dtype from HBM; widen in-register only.
    x = x_ref[...].astype(jnp.float32)
    t = t_ref[...].astype(jnp.float32)
    per_elem = _bce_elem(x, t, pos_weight)

    # Logical (UNCLAMPED) block index.  The over-range step of the last core
    # maps its DMA to an already-resident block (see in_map in the wrapper),
    # but its contribution must still be zeroed here — do NOT switch this to
    # the clamped index or the last block would be double-counted.
    block_idx = c * blocks_per_core + i
    # Row-threshold validity: scalar int32 row counts (<= rows ~ n/128), so no
    # 32-bit overflow even for HBM-filling inputs (unlike a flat element idx).
    valid_rows = rows - block_idx * tile_rows

    folds = tile_rows // SUBLANES

    @pl.when(valid_rows >= tile_rows)
    def _():
        # Interior (full) block: zero mask arithmetic — pure VPU fold into the
        # resident (8,128) accumulator.
        o_ref[...] += jnp.sum(
            per_elem.reshape(folds, SUBLANES, LANES), axis=0)

    @pl.when(valid_rows < tile_rows)
    def _():
        # Partial last block / clamped over-range block: one iota + compare +
        # select.  Keep the select (not multiply-by-mask): the invalid region
        # of the VMEM buffer is unspecified and may contain NaN/Inf, which a
        # select correctly discards.
        row_ids = jax.lax.broadcasted_iota(jnp.int32, per_elem.shape, 0)
        masked = jnp.where(row_ids < valid_rows, per_elem, 0.0)
        o_ref[...] += jnp.sum(
            masked.reshape(folds, SUBLANES, LANES), axis=0)


def focal_loss(logits, targets, *, pos_weight=2.0, gamma=2.0):
    """JAX/Pallas equivalent of FocalLoss.forward (reduction='mean')."""
    n_elems = logits.size

    x = logits.reshape(-1)   # no wrapper astype: keep the narrowest dtype
    t = targets.reshape(-1)

    # Main body: largest 1024-aligned prefix -> (rows, 128) with rows % 8 == 0.
    # For aligned sizes (common case) this is a bitcast reshape: no jnp.pad,
    # no full-array HBM copy.  The <1024-element ragged tail is summed in
    # plain JAX.
    main_len = (n_elems // CHUNK) * CHUNK
    rows = main_len // LANES

    tail_sum = jnp.float32(0.0)
    if main_len < n_elems:
        xt = x[main_len:].astype(jnp.float32)
        tt = t[main_len:].astype(jnp.float32)
        tail_sum = jnp.sum(_bce_elem(xt, tt, float(pos_weight)))

    main_sum = jnp.float32(0.0)
    if rows > 0:
        x2 = x[:main_len].reshape(rows, LANES)
        t2 = t[:main_len].reshape(rows, LANES)

        # Block sized by bytes (~2 MiB for the widest operand).
        max_itemsize = max(x.dtype.itemsize, t.dtype.itemsize)
        target_rows = max(
            SUBLANES,
            (TARGET_BLOCK_BYTES // (LANES * max_itemsize)) // SUBLANES * SUBLANES)
        tile_rows = min(target_rows, rows)          # multiple of 8, or == rows
        num_blocks = (rows + tile_rows - 1) // tile_rows

        # 2-way block-range split when there is enough work.  On single-TC
        # chips it is a harmless sequential loop; on dual-TC chips (v7x) the
        # CORE_PARALLEL semantics below put half the rows on each TensorCore.
        num_core_splits = 2 if num_blocks >= 2 else 1
        blocks_per_core = (num_blocks + num_core_splits - 1) // num_core_splits

        def in_map(c, i):
            b = c * blocks_per_core + i
            # Clamp the (at most one) over-range step of the last core to the
            # block it just processed: the pipeline sees an unchanged block
            # index and reuses the resident buffer (no wasted HBM fetch).  Its
            # contribution is zeroed in-kernel using the UNCLAMPED index.
            return (jnp.minimum(b, num_blocks - 1), 0)

        kernel = functools.partial(
            _focal_bce_kernel, pos_weight=float(pos_weight), rows=rows,
            tile_rows=tile_rows, blocks_per_core=blocks_per_core)

        if num_core_splits > 1 and _is_dual_tensorcore_chip():
            dim_sem = (getattr(pltpu, "CORE_PARALLEL", "parallel"), "arbitrary")
        else:
            dim_sem = ("parallel", "arbitrary")

        partials = pl.pallas_call(
            kernel,
            out_shape=jax.ShapeDtypeStruct(
                (num_core_splits * SUBLANES, LANES), jnp.float32),
            grid_spec=pltpu.PrefetchScalarGridSpec(
                num_scalar_prefetch=0,
                grid=(num_core_splits, blocks_per_core),
                in_specs=[
                    pl.BlockSpec((tile_rows, LANES), in_map),
                    pl.BlockSpec((tile_rows, LANES), in_map),
                ],
                out_specs=pl.BlockSpec((SUBLANES, LANES), lambda c, i: (c, 0)),
            ),
            compiler_params=pltpu.CompilerParams(dimension_semantics=dim_sem),
        )(x2, t2)

        # Tiny final cross-lane reduction (at most 16x128 values).  Kept in
        # the wrapper: it keeps multi-core output aggregation trivially
        # correct and only costs a few us for small inputs.
        main_sum = jnp.sum(partials)

    loss_sum = main_sum + tail_sum
    ce_loss = loss_sum / jnp.float32(n_elems)       # reduction='mean'
    pt = jnp.exp(-ce_loss)
    return ((1.0 - pt) ** gamma) * ce_loss          # .mean() of a scalar


def _reference(logits, targets, pos_weight=2.0, gamma=2.0):
    x = logits.astype(jnp.float32)
    t = targets.astype(jnp.float32)
    per = _bce_elem(x, t, pos_weight)
    ce = jnp.mean(per)
    pt = jnp.exp(-ce)
    return ((1.0 - pt) ** gamma) * ce


if __name__ == "__main__":
    key = jax.random.PRNGKey(0)
    k1, k2 = jax.random.split(key)

    # NCHW logits and binary targets, small shapes.
    B, C, H, W = 2, 4, 16, 16
    logits = jax.random.normal(k1, (B, C, H, W), dtype=jnp.float32) * 2.0
    targets = (jax.random.uniform(k2, (B, C, H, W)) > 0.5).astype(jnp.float32)

    out = focal_loss(logits, targets, pos_weight=2.0, gamma=2.0)
    out = jax.block_until_ready(out)

    ref = _reference(logits, targets)
    assert jnp.allclose(out, ref, rtol=1e-5, atol=1e-6), (out, ref)

    print("KERNEL_OK")
</pallas_src>

<mosaic_0001>
module attributes {stable_mosaic.version = 11 : i64} {
  func.func @_focal_bce_kernel(%arg0: i32, %arg1: i32, %arg2: memref<16x128xf32, #tpu.memory_space<vmem>>, %arg3: memref<16x128xf32, #tpu.memory_space<vmem>>, %arg4: memref<8x128xf32, #tpu.memory_space<vmem>>) attributes {dimension_semantics = [#tpu.dimension_semantics<parallel>, #tpu.dimension_semantics<arbitrary>], iteration_bounds = array<i64: 1, 1>, scalar_prefetch = 0 : i64, scratch_operands = 0 : i64, tpu.core_type = #tpu.core_type<tc>, window_params = [{transform_indices = @transform_0, window_bounds = array<i64: 16, 128>}, {transform_indices = @transform_1, window_bounds = array<i64: 16, 128>}, {transform_indices = @transform_2, window_bounds = array<i64: 8, 128>}]} {
    %c0_i32 = arith.constant 0 : i32
    %0 = arith.cmpi eq, %arg1, %c0_i32 : i32
    %1 = arith.extui %0 : i1 to i32
    %c0_i32_0 = arith.constant 0 : i32
    %2 = arith.cmpi ne, %1, %c0_i32_0 : i32
    scf.if %2 {
      %cst_14 = arith.constant 0.000000e+00 : f32
      %34 = vector.broadcast %cst_14 : f32 to vector<8x128xf32>
      %c0_15 = arith.constant 0 : index
      %c0_16 = arith.constant 0 : index
      %35 = vector.load %arg4[%c0_15, %c0_16] : memref<8x128xf32, #tpu.memory_space<vmem>>, vector<8x128xf32>
      tpu.vector_store %arg4[%c0_15, %c0_16], %34 {strides = array<i32>} : memref<8x128xf32, #tpu.memory_space<vmem>>, vector<8x128xf32>,
    } else {
    }
    %c0 = arith.constant 0 : index
    %c0_1 = arith.constant 0 : index
    %3 = vector.load %arg2[%c0, %c0_1] : memref<16x128xf32, #tpu.memory_space<vmem>>, vector<16x128xf32>
    %c0_2 = arith.constant 0 : index
    %c0_3 = arith.constant 0 : index
    %4 = vector.load %arg3[%c0_2, %c0_3] : memref<16x128xf32, #tpu.memory_space<vmem>>, vector<16x128xf32>
    %cst = arith.constant 0.000000e+00 : f32
    %5 = vector.broadcast %cst : f32 to vector<16x128xf32>
    %6 = arith.subf %5, %3 : vector<16x128xf32>
    %cst_4 = arith.constant 0.000000e+00 : f32
    %7 = vector.broadcast %cst_4 : f32 to vector<16x128xf32>
    %8 = arith.maximumf %6, %7 : vector<16x128xf32>
    %9 = math.absf %3 : vector<16x128xf32>
    %cst_5 = arith.constant 0.000000e+00 : f32
    %10 = vector.broadcast %cst_5 : f32 to vector<16x128xf32>
    %11 = arith.subf %10, %9 : vector<16x128xf32>
    %12 = math.exp %11 : vector<16x128xf32>
    %13 = math.log1p %12 : vector<16x128xf32>
    %14 = arith.addf %8, %13 : vector<16x128xf32>
    %cst_6 = arith.constant 1.000000e+00 : f32
    %15 = vector.broadcast %cst_6 : f32 to vector<16x128xf32>
    %16 = arith.subf %15, %4 : vector<16x128xf32>
    %17 = arith.mulf %16, %3 : vector<16x128xf32>
    %cst_7 = arith.constant 1.000000e+00 : f32
    %18 = vector.broadcast %cst_7 : f32 to vector<16x128xf32>
    %19 = arith.mulf %18, %4 : vector<16x128xf32>
    %cst_8 = arith.constant 1.000000e+00 : f32
    %20 = vector.broadcast %cst_8 : f32 to vector<16x128xf32>
    %21 = arith.addf %20, %19 : vector<16x128xf32>
    %22 = arith.mulf %21, %14 : vector<16x128xf32>
    %23 = arith.addf %17, %22 : vector<16x128xf32>
    %c1_i32 = arith.constant 1 : i32
    %24 = arith.muli %arg0, %c1_i32 : i32
    %25 = arith.addi %24, %arg1 : i32
    %c16_i32 = arith.constant 16 : i32
    %26 = arith.muli %25, %c16_i32 : i32
    %c16_i32_9 = arith.constant 16 : i32
    %27 = arith.subi %c16_i32_9, %26 : i32
    %c16_i32_10 = arith.constant 16 : i32
    %28 = arith.cmpi sge, %27, %c16_i32_10 : i32
    %29 = arith.extui %28 : i1 to i32
    %c0_i32_11 = arith.constant 0 : i32
    %30 = arith.cmpi ne, %29, %c0_i32_11 : i32
    scf.if %30 {
      %c0_14 = arith.constant 0 : index
      %c0_15 = arith.constant 0 : index
      %34 = vector.load %arg4[%c0_14, %c0_15] : memref<8x128xf32, #tpu.memory_space<vmem>>, vector<8x128xf32>
      %35 = vector.shape_cast %23 : vector<16x128xf32> to vector<2x8x128xf32>
      %cst_16 = arith.constant dense<0.000000e+00> : vector<8x128xf32>
      %36 = vector.multi_reduction <add>, %35, %cst_16 [0] : vector<2x8x128xf32> to vector<8x128xf32>
      %37 = arith.addf %34, %36 : vector<8x128xf32>
      %c0_17 = arith.constant 0 : index
      %c0_18 = arith.constant 0 : index
      %38 = vector.load %arg4[%c0_17, %c0_18] : memref<8x128xf32, #tpu.memory_space<vmem>>, vector<8x128xf32>
      tpu.vector_store %arg4[%c0_17, %c0_18], %37 {strides = array<i32>} : memref<8x128xf32, #tpu.memory_space<vmem>>, vector<8x128xf32>,
    } else {
    }
    %c16_i32_12 = arith.constant 16 : i32
    %31 = arith.cmpi slt, %27, %c16_i32_12 : i32
    %32 = arith.extui %31 : i1 to i32
    %c0_i32_13 = arith.constant 0 : i32
    %33 = arith.cmpi ne, %32, %c0_i32_13 : i32
    scf.if %33 {
      %34 = tpu.iota {dimensions = array<i32: 0>} : vector<16x128xi32>
      %35 = vector.broadcast %27 : i32 to vector<16x128xi32>
      %36 = arith.cmpi slt, %34, %35 : vector<16x128xi32>
      %cst_14 = arith.constant 0.000000e+00 : f32
      %37 = vector.broadcast %cst_14 : f32 to vector<16x128xf32>
      %38 = arith.select %36, %23, %37 : vector<16x128xi1>, vector<16x128xf32>
      %c0_15 = arith.constant 0 : index
      %c0_16 = arith.constant 0 : index
      %39 = vector.load %arg4[%c0_15, %c0_16] : memref<8x128xf32, #tpu.memory_space<vmem>>, vector<8x128xf32>
      %40 = vector.shape_cast %38 : vector<16x128xf32> to vector<2x8x128xf32>
      %cst_17 = arith.constant dense<0.000000e+00> : vector<8x128xf32>
      %41 = vector.multi_reduction <add>, %40, %cst_17 [0] : vector<2x8x128xf32> to vector<8x128xf32>
      %42 = arith.addf %39, %41 : vector<8x128xf32>
      %c0_18 = arith.constant 0 : index
      %c0_19 = arith.constant 0 : index
      %43 = vector.load %arg4[%c0_18, %c0_19] : memref<8x128xf32, #tpu.memory_space<vmem>>, vector<8x128xf32>
      tpu.vector_store %arg4[%c0_18, %c0_19], %42 {strides = array<i32>} : memref<8x128xf32, #tpu.memory_space<vmem>>, vector<8x128xf32>,
    } else {
    }
    return
  }
  func.func @transform_0(%arg0: i32, %arg1: i32) -> (i32, i32) {
    %c1_i32 = arith.constant 1 : i32
    %0 = arith.muli %arg0, %c1_i32 : i32
    %1 = arith.addi %0, %arg1 : i32
    %c0_i32 = arith.constant 0 : i32
    %2 = arith.minsi %1, %c0_i32 : i32
    %c0_i32_0 = arith.constant 0 : i32
    %c0_i32_1 = arith.constant 0 : i32
    return %2, %c0_i32_0 : i32, i32
  }
  func.func @transform_1(%arg0: i32, %arg1: i32) -> (i32, i32) {
    %c1_i32 = arith.constant 1 : i32
    %0 = arith.muli %arg0, %c1_i32 : i32
    %1 = arith.addi %0, %arg1 : i32
    %c0_i32 = arith.constant 0 : i32
    %2 = arith.minsi %1, %c0_i32 : i32
    %c0_i32_0 = arith.constant 0 : i32
    %c0_i32_1 = arith.constant 0 : i32
    return %2, %c0_i32_0 : i32, i32
  }
  func.func @transform_2(%arg0: i32, %arg1: i32) -> (i32, i32) {
    %c0_i32 = arith.constant 0 : i32
    %c0_i32_0 = arith.constant 0 : i32
    return %arg0, %c0_i32 : i32, i32
  }
}

</mosaic_0001>

<bundles_post_ra>
// kernel: tpu_custom_call.1
= control target key start
LH: loop header
LB: loop body
LE: loop exit
PB: predicated region body
PF: predicated region fallthrough
CT: control target
= control target key end

     0   :  { %7 = vsyncpa [#allocation3], 0  ;;  %s300_s0 = inlined_call_operand.hbm [shape: f32[16,128], index: 0, kind: input, shape index: {}]   ;;  %s301_s1 = inlined_call_operand.hbm [shape: f32[16,128], index: 1, kind: input, shape index: {}]   ;;  %s302_s2 = inlined_call_operand.hbm [shape: f32[8,128], index: 2, kind: output, shape index: {}]  }
   0x1   :  { %8 = vsyncpa [#allocation6], 0 }
   0x2   :  { %9 = vsyncpa [#allocation4], 0  ;;  %s244_s9 = smov [#allocation2]   ;;  %s172_s13 = scalar_lea.hbm %s300_s0, 256 }
   0x3   :  { %s21_s10 = sshll.u32 %s244_s9, 4  ;;  %p173_p0 = scmp.ne.s32.totalorder %s300_s0, %s172_s13  ;;  %s22_s10 = int_to_ptr.vmem [resolvable:$true] %s21_s10 }
   0x4   :  { %p176_p1 = scmp.lt.u32.totalorder %s172_s13, %s300_s0 }
   0x6   :  { %p178_p2 = pnand %p176_p1, %p173_p0 }
   0x8   :  { %181 = shalt.err (!%p178_p2)
}
   0x9   :  { %s182_s18 = scalar_lea.vmem %s22_s10, 256  ;;  %p187_p4 = scmp.lt.s32.totalorder %s22_s10, %s22_s10 }
   0xa   :  { %p183_p3 = scmp.ne.s32.totalorder %s22_s10, %s182_s18  ;;  %p188_p5 = scmp.lt.s32.totalorder %s182_s18, %s182_s18 }
   0xc   :  { %p189_p6 = por %p188_p5, %p187_p4 }
   0xe   :  { %p190_p7 = pnand %p189_p6, %p183_p3 }
  0x10   :  { %193 = shalt.err (!%p190_p7)
}
  0x11   :  { %s245_s19 = smov 128   ;;  %s246_s20 = smov 8  }
  0x12   :  { %27 = dma.hbm_to_vmem [thread:$0]  %s300_s0, 256, %s22_s10, [#allocation3], %s245_s19, %s245_s19, %s246_s20  }
  0x13   :  { %s247_s23 = smov [#allocation5]   ;;  %s194_s27 = scalar_lea.hbm %s301_s1, 256 }
  0x14   :  { %s39_s24 = sshll.u32 %s247_s23, 4  ;;  %p195_p8 = scmp.ne.s32.totalorder %s301_s1, %s194_s27  ;;  %s40_s24 = int_to_ptr.vmem [resolvable:$true] %s39_s24 }
  0x15   :  { %p198_p9 = scmp.lt.u32.totalorder %s194_s27, %s301_s1 }
  0x17   :  { %p200_p10 = pnand %p198_p9, %p195_p8 }
  0x19   :  { %203 = shalt.err (!%p200_p10)
}
  0x1a   :  { %s204_s4 = scalar_lea.vmem %s40_s24, 256  ;;  %p209_p12 = scmp.lt.s32.totalorder %s40_s24, %s40_s24 }
  0x1b   :  { %p205_p11 = scmp.ne.s32.totalorder %s40_s24, %s204_s4  ;;  %p210_p13 = scmp.lt.s32.totalorder %s204_s4, %s204_s4 }
  0x1d   :  { %p211_p0 = por %p210_p13, %p209_p12 }
  0x1f   :  { %p212_p1 = pnand %p211_p0, %p205_p11 }
  0x21   :  { %215 = shalt.err (!%p212_p1)
}
  0x22   :  { %45 = dma.hbm_to_vmem [thread:$0]  %s301_s1, 256, %s40_s24, [#allocation6], %s245_s19, %s245_s19, %s246_s20  }
  0x23   :  { %238 = dma.done.wait [#allocation3], 256  }
  0x24   :  { %239 = vsyncadd [#allocation3], 4294967040 }
  0x25   :  { %240 = dma.done.wait [#allocation6], 256  }
  0x26   :  { %241 = vsyncadd [#allocation6], 4294967040  ;;  %v65_v0 = vld [vmem:[#allocation2] sm:$0xff]  ;;  %v66_v1 = vld [vmem:[#allocation2 + $0x8] sm:$0xff]  ;;  %s248_s1 = smov [#allocation7]  }
  0x27   :  { %v73_v2 = vand.u32 2147483647, %v65_v0  ;;  %v74_v3 = vand.u32 2147483647, %v66_v1  ;;  %v69_v15 = vsub.f32 0.0, %v65_v0  ;;  %v67_v18 = vld [vmem:[#allocation5] sm:$0xff] }
  0x28   :  { %v70_v19 = vsub.f32 0.0, %v66_v1  ;;  %v68_v21 = vld [vmem:[#allocation5 + $0x8] sm:$0xff]  ;;  %v101_v26 = vsub.f32 1.0, %v67_v18  ;;  %v105_v32 = vadd.f32 1.0, %v67_v18  ;;  %s144_s6 = sshll.u32 %s248_s1, 4  ;;  %s145_s6 = int_to_ptr.vmem [resolvable:$true] %s144_s6 }
  0x29   :  { %v75_v4 = vsub.f32 0.0, %v73_v2  ;;  %v76_v5 = vsub.f32 0.0, %v74_v3  ;;  %v71_v24 = vmax.f32 %v69_v15, 0.0  ;;  %v102_v30 = vsub.f32 1.0, %v68_v21  ;;  %s216_s7 = scalar_lea.vmem %s145_s6, 128  ;;  %p221_p3 = scmp.lt.s32.totalorder %s145_s6, %s145_s6 }
  0x2a   :  { %v72_v28 = vmax.f32 %v70_v19, 0.0  ;;  %v106_v34 = vadd.f32 1.0, %v68_v21  ;;  %v103_v37 = vmul.f32 %v101_v26, %v65_v0  ;;  %p217_p2 = scmp.ne.s32.totalorder %s145_s6, %s216_s7  ;;  %p222_p4 = scmp.lt.s32.totalorder %s216_s7, %s216_s7 }
  0x2b   :  { %v77_v6 = vmul.f32 1.442695, %v75_v4  ;;  %v79_v7 = vmul.f32 1.442695, %v76_v5  ;;  %v104_v39 = vmul.f32 %v102_v30, %v66_v1 }
  0x2c   :  { %p223_p5 = por %p222_p4, %p221_p3 }
  0x2d   :  { %164 = vpow2.f32 %v77_v6 }
  0x2e   :  { %166 = vpow2.f32 %v79_v7  ;;  %p224_p6 = pnand %p223_p5, %p217_p2 }
  0x37   :  { %v165_v8 = vpop.eup %164 }
  0x38   :  { %v167_v9 = vpop.eup %166  ;;  %v81_v10 = vadd.f32 1.0, %v165_v8  ;;  %v84_v12 = vmul.f32 -0.5, %v165_v8  ;;  %v87_v16 = vand.u32 2147483647, %v165_v8 }
  0x39   :  { %v90_v11 = vadd.f32 1.0, %v167_v9  ;;  %v93_v13 = vmul.f32 -0.5, %v167_v9  ;;  %v96_v20 = vand.u32 2147483647, %v167_v9 }
  0x3a   :  { %168 = vlog2.f32 %v81_v10  ;;  %v85_v14 = vadd.f32 1.0, %v84_v12  ;;  %vm88_vm0 = vcmp.lt.f32.partialorder %v87_v16, 0.0004427343 }
  0x3b   :  { %170 = vlog2.f32 %v90_v11  ;;  %v94_v17 = vadd.f32 1.0, %v93_v13  ;;  %vm97_vm1 = vcmp.lt.f32.partialorder %v96_v20, 0.0004427343 }
  0x3c   :  { %v86_v22 = vmul.f32 %v165_v8, %v85_v14 }
  0x3d   :  { %v95_v25 = vmul.f32 %v167_v9, %v94_v17 }
  0x44   :  { %v169_v23 = vpop.eup %168 }
  0x45   :  { %v171_v27 = vpop.eup %170  ;;  %v83_v29 = vmul.f32 0.6931472, %v169_v23 }
  0x46   :  { %v92_v31 = vmul.f32 0.6931472, %v171_v27 }
  0x47   :  { %v89_v33 = vsel %vm88_vm0, %v86_v22, %v83_v29 }
  0x48   :  { %v98_v35 = vsel %vm97_vm1, %v95_v25, %v92_v31  ;;  %v99_v36 = vadd.f32 %v89_v33, %v71_v24 }
  0x49   :  { %v100_v38 = vadd.f32 %v98_v35, %v72_v28 }
  0x4a   :  { %v107_v40 = vmul.f32 %v105_v32, %v99_v36 }
  0x4b   :  { %v108_v41 = vmul.f32 %v106_v34, %v100_v38 }
  0x4c   :  { %v109_v42 = vadd.f32 %v107_v40, %v103_v37 }
  0x4d   :  { %v110_v43 = vadd.f32 %v108_v41, %v104_v39 }
  0x4f   :  { %v119_v44 = vadd.f32 %v110_v43, %v109_v42 }
  0x51   :  { %121 = vst [vmem:[#allocation7] sm:$0xff] %v119_v44 }
  0x52   :  { %227 = shalt.err (!%p224_p6)
}
  0x53   :  { %s228_s10 = scalar_lea.hbm %s302_s2, 128 }
  0x54   :  { %p229_p7 = scmp.ne.s32.totalorder %s302_s2, %s228_s10  ;;  %p232_p8 = scmp.lt.u32.totalorder %s228_s10, %s302_s2 }
  0x56   :  { %p234_p9 = pnand %p232_p8, %p229_p7 }
  0x58   :  { %237 = shalt.err (!%p234_p9)
}
  0x59   :  { %147 = dma.vmem_to_hbm [thread:$0]  %s145_s6, 128, %s302_s2, [#allocation4]  }
  0x5a   :  { %242 = dma.done.wait [#allocation4], 128  }
  0x5b   :  { %243 = vsyncadd [#allocation4], 4294967168 }
  0x5c   :  { %151 = vsyncpa [#allocation3], 1 }
  0x5d   :  { %152 = vsyncpa [#allocation6], 1 }
  0x5e   :  { %153 = vsyncpa [#allocation4], 1 }

</bundles_post_ra>
